<compile_context>
chip_gen: v5e
topology: v5e:2x2
jax: 0.10.0
libtpu: 0.0.40
codegen_flags: <defaults>
</compile_context>

<pallas_src>
import functools

import jax
import jax.numpy as jnp
from jax.experimental import pallas as pl
from jax.experimental.pallas import tpu as pltpu


def _patch_embed_kernel(patches_ref, w_ref, b_ref, out_ref):
    # patches_ref: (TM, K) bf16     M-tile of flattened patches
    # w_ref:       (K, E)  bf16     resident projection matrix
    # b_ref:       (1, E)  f32      resident bias
    # out_ref:     (TM, E) out dtype
    acc = jnp.dot(patches_ref[...], w_ref[...],
                  preferred_element_type=jnp.float32)
    out_ref[...] = (acc + b_ref[...]).astype(out_ref.dtype)


@functools.partial(jax.jit, static_argnames=("img_size", "patch_size", "tm"))
def patch_embed_forward(x, w_mat, bias, *, img_size, patch_size, tm=512):
    """Equivalent of PatchEmbed.forward.

    x:      (B, C, H, W)  NCHW, same as PyTorch
    w_mat:  (K, E)        pre-transposed Conv2d weight, K = C * P_h * P_w,
                          flattened in (C, ph, pw) order
    bias:   (E,)
    returns (B, num_patches, E) in x.dtype
    """
    B, C, H, W = x.shape
    if H != img_size[0] or W != img_size[1]:
        raise ValueError(
            f"Input image size ({H}*{W}) doesn't match model "
            f"({img_size[0]}*{img_size[1]}).")
    P_h, P_w = patch_size
    K, E = w_mat.shape
    gh, gw = H // P_h, W // P_w
    num_patches = gh * gw
    M = B * num_patches

    # --- im2col in (C, ph, pw) order, done in bf16 (one fused XLA pass) -----
    # (B, C, gh, P_h, gw, P_w) -> (B, gh, gw, C, P_h, P_w) -> (B*N, K)
    patches = x.astype(jnp.bfloat16).reshape(B, C, gh, P_h, gw, P_w)
    patches = patches.transpose(0, 2, 4, 1, 3, 5).reshape(M, K)

    w_bf16 = w_mat.astype(jnp.bfloat16)          # no-op if already bf16
    b_mat = bias.astype(jnp.float32).reshape(1, E)

    # --- hot path: M-tiled Pallas matmul + bias -----------------------------
    TM = min(tm, M)
    grid = (pl.cdiv(M, TM),)

    out = pl.pallas_call(
        _patch_embed_kernel,
        out_shape=jax.ShapeDtypeStruct((M, E), x.dtype),
        grid_spec=pltpu.PrefetchScalarGridSpec(
            num_scalar_prefetch=0,
            grid=grid,
            in_specs=[
                pl.BlockSpec((TM, K), lambda i: (i, 0)),   # patches: tiled on M
                pl.BlockSpec((K, E), lambda i: (0, 0)),    # weight: resident
                pl.BlockSpec((1, E), lambda i: (0, 0)),    # bias:   resident
            ],
            out_specs=pl.BlockSpec((TM, E), lambda i: (i, 0)),
        ),
        compiler_params=pltpu.CompilerParams(
            dimension_semantics=("parallel",),     # independent M tiles
            vmem_limit_bytes=32 * 1024 * 1024,     # safe on v5e/v6e/v7x
        ),
    )(patches, w_bf16, b_mat)

    return out.reshape(B, num_patches, E)


class PatchEmbedPallas:
    """Image to Patch Embedding (Pallas TPU implementation)."""

    def __init__(self, img_size=224, patch_size=16, in_chans=3, embed_dim=768,
                 key=None):
        img_size = (img_size, img_size) if isinstance(img_size, int) else tuple(img_size)
        patch_size = (patch_size, patch_size) if isinstance(patch_size, int) else tuple(patch_size)
        self.img_size = img_size
        self.patch_size = patch_size
        self.num_patches = (img_size[1] // patch_size[1]) * (img_size[0] // patch_size[0])

        if key is None:
            key = jax.random.PRNGKey(0)
        k_w, k_b = jax.random.split(key)
        fan_in = in_chans * patch_size[0] * patch_size[1]
        bound = 1.0 / (fan_in ** 0.5)
        # Deterministic init matching nn.Conv2d's default uniform(-1/sqrt(fan_in), ...)
        self.weight = jax.random.uniform(
            k_w, (embed_dim, in_chans, patch_size[0], patch_size[1]),
            dtype=jnp.float32, minval=-bound, maxval=bound)
        self.bias = jax.random.uniform(
            k_b, (embed_dim,), dtype=jnp.float32, minval=-bound, maxval=bound)

        # Pre-transposed bf16 projection matrix (K, E), lane-dense on E.
        K = in_chans * patch_size[0] * patch_size[1]
        self.w_mat = self.weight.reshape(embed_dim, K).T.astype(jnp.bfloat16)

    def __call__(self, x):
        return patch_embed_forward(
            x, self.w_mat, self.bias,
            img_size=self.img_size, patch_size=self.patch_size)


if __name__ == "__main__":
    # Small shapes consistent with the module: B=2, C=4, H=W=16, patch=4, E=32
    B, C, H, W = 2, 4, 16, 16
    P, E = 4, 32

    key = jax.random.PRNGKey(0)
    k_x, k_params = jax.random.split(key)
    x = jax.random.normal(k_x, (B, C, H, W), dtype=jnp.float32)

    module = PatchEmbedPallas(img_size=H, patch_size=P, in_chans=C,
                              embed_dim=E, key=k_params)

    out = module(x)
    out = jax.block_until_ready(out)
    assert out.shape == (B, module.num_patches, E), out.shape

    # Reference 1 (tight): same bf16 inputs, f32 accumulation, via lax conv
    # with kernel=stride=patch (identical semantics to nn.Conv2d).
    ref_bf16 = jax.lax.conv_general_dilated(
        x.astype(jnp.bfloat16), module.weight.astype(jnp.bfloat16),
        window_strides=(P, P), padding="VALID",
        dimension_numbers=("NCHW", "OIHW", "NCHW"),
        preferred_element_type=jnp.float32)
    ref_bf16 = ref_bf16 + module.bias.reshape(1, E, 1, 1)
    ref_bf16 = ref_bf16.reshape(B, E, -1).transpose(0, 2, 1)
    assert jnp.allclose(out.astype(jnp.float32), ref_bf16, atol=2e-3, rtol=2e-3), \
        float(jnp.max(jnp.abs(out.astype(jnp.float32) - ref_bf16)))

    # Reference 2 (loose): full-f32 conv; tolerance accounts for the bf16
    # operand rounding in the kernel's compute path.
    ref_f32 = jax.lax.conv_general_dilated(
        x, module.weight, window_strides=(P, P), padding="VALID",
        dimension_numbers=("NCHW", "OIHW", "NCHW"))
    ref_f32 = ref_f32 + module.bias.reshape(1, E, 1, 1)
    ref_f32 = ref_f32.reshape(B, E, -1).transpose(0, 2, 1)
    assert jnp.allclose(out, ref_f32, atol=5e-2, rtol=5e-2), \
        float(jnp.max(jnp.abs(out - ref_f32)))

    print("KERNEL_OK")
</pallas_src>

<mosaic_0001>
module attributes {stable_mosaic.version = 11 : i64} {
  func.func @_patch_embed_kernel(%arg0: i32, %arg1: memref<32x64xbf16, #tpu.memory_space<vmem>>, %arg2: memref<64x32xbf16, #tpu.memory_space<vmem>>, %arg3: memref<1x32xf32, #tpu.memory_space<vmem>>, %arg4: memref<32x32xf32, #tpu.memory_space<vmem>>) attributes {dimension_semantics = [#tpu.dimension_semantics<parallel>], iteration_bounds = array<i64: 1>, scalar_prefetch = 0 : i64, scratch_operands = 0 : i64, tpu.core_type = #tpu.core_type<tc>, window_params = [{transform_indices = @transform_0, window_bounds = array<i64: 32, 64>}, {pipeline_mode = #tpu.pipeline_mode<synchronous>, transform_indices = @transform_1, window_bounds = array<i64: 64, 32>}, {pipeline_mode = #tpu.pipeline_mode<synchronous>, transform_indices = @transform_2, window_bounds = array<i64: 1, 32>}, {transform_indices = @transform_3, window_bounds = array<i64: 32, 32>}]} {
    %c0 = arith.constant 0 : index
    %c0_0 = arith.constant 0 : index
    %0 = vector.load %arg1[%c0, %c0_0] : memref<32x64xbf16, #tpu.memory_space<vmem>>, vector<32x64xbf16>
    %c0_1 = arith.constant 0 : index
    %c0_2 = arith.constant 0 : index
    %1 = vector.load %arg2[%c0_1, %c0_2] : memref<64x32xbf16, #tpu.memory_space<vmem>>, vector<64x32xbf16>
    %cst = arith.constant dense<0.000000e+00> : vector<32x32xf32>
    %2 = tpu.matmul %0, %1, %cst {dimension_numbers = #tpu.dot_dimension_numbers<[1], [0], [0], [1], [0, 0, 1, 1], [], []>} : vector<32x64xbf16>, vector<64x32xbf16>, vector<32x32xf32> -> vector<32x32xf32>
    %c0_3 = arith.constant 0 : index
    %c0_4 = arith.constant 0 : index
    %3 = vector.load %arg3[%c0_3, %c0_4] : memref<1x32xf32, #tpu.memory_space<vmem>>, vector<1x32xf32>
    %4 = vector.broadcast %3 : vector<1x32xf32> to vector<32x32xf32>
    %5 = arith.addf %2, %4 : vector<32x32xf32>
    %c0_5 = arith.constant 0 : index
    %c0_6 = arith.constant 0 : index
    %6 = vector.load %arg4[%c0_5, %c0_6] : memref<32x32xf32, #tpu.memory_space<vmem>>, vector<32x32xf32>
    tpu.vector_store %arg4[%c0_5, %c0_6], %5 {strides = array<i32>} : memref<32x32xf32, #tpu.memory_space<vmem>>, vector<32x32xf32>,
    return
  }
  func.func @transform_0(%arg0: i32) -> (i32, i32) {
    %c0_i32 = arith.constant 0 : i32
    %c0_i32_0 = arith.constant 0 : i32
    return %arg0, %c0_i32 : i32, i32
  }
  func.func @transform_1(%arg0: i32) -> (i32, i32) {
    %c0_i32 = arith.constant 0 : i32
    %c0_i32_0 = arith.constant 0 : i32
    %c0_i32_1 = arith.constant 0 : i32
    return %c0_i32, %c0_i32_0 : i32, i32
  }
  func.func @transform_2(%arg0: i32) -> (i32, i32) {
    %c0_i32 = arith.constant 0 : i32
    %c0_i32_0 = arith.constant 0 : i32
    %c0_i32_1 = arith.constant 0 : i32
    return %c0_i32, %c0_i32_0 : i32, i32
  }
  func.func @transform_3(%arg0: i32) -> (i32, i32) {
    %c0_i32 = arith.constant 0 : i32
    %c0_i32_0 = arith.constant 0 : i32
    return %arg0, %c0_i32 : i32, i32
  }
}

</mosaic_0001>

<bundles_post_ra>
// kernel: patch_embed_forward.1
= control target key start
LH: loop header
LB: loop body
LE: loop exit
PB: predicated region body
PF: predicated region fallthrough
CT: control target
= control target key end

     0   :  { %s232_s0 = inlined_call_operand.vmem [shape: bf16[32,64], index: 0, kind: input, shape index: {}]   ;;  %s233_s1 = inlined_call_operand.vmem [shape: bf16[64,32], index: 1, kind: input, shape index: {}]   ;;  %s234_s2 = inlined_call_operand.vmem [shape: f32[1,32], index: 2, kind: input, shape index: {}]   ;;  %s235_s3 = inlined_call_operand.hbm [shape: f32[32,32], index: 3, kind: output, shape index: {}]  }
   0x1   :  { %v146_v0 = vld [vmem:[%s233_s1 + $0x18] sm:$0xff]  ;;  %v145_v1 = vld [vmem:[%s233_s1 + $0x10] sm:$0xff] }
   0x2   :  { %77 = vmatpush.bf16.msra.mxu0 %v146_v0  ;;  %147 = vmatpush.bf16.msra.mxu1 %v146_v0 }
   0x3   :  { %8 = vsyncpa [#allocation3], 0  ;;  %v144_v2 = vld [vmem:[%s233_s1 + $0x8] sm:$0xff]  ;;  %v143_v3 = vld [vmem:[%s233_s1] sm:$0xff]  ;;  %vm66_vm0 = vcmask 523264   ;;  %vm92_vm1 = vcmask 261120  }
   0x4   :  { %v141_v4 = vld [vmem:[%s232_s0] sm:$0xff]  ;;  %v142_v5 = vld [vmem:[%s232_s0 + $0x8] sm:$0xff]  ;;  %s181_s1 = smov [#allocation2]   ;;  %s103_s28 = sshll.u32 %s235_s3, 4  ;;  %s104_s28 = int_to_ptr.hbm [resolvable:$true] %s103_s28 }
   0x5   :  { %v154_v6 = vld [vmem:[%s234_s2] ss:$0 sm:$0xff]  ;;  %s101_s0 = sshll.u32 %s181_s1, 4  ;;  %s182_s2 = smov 128   ;;  %s102_s0 = int_to_ptr.vmem [resolvable:$true] %s101_s0 }
   0x6   :  { %78 = vmatpush.bf16.msra.mxu0 %v145_v1  ;;  %148 = vmatpush.bf16.msra.mxu1 %v145_v1  ;;  %s183_s29 = smov 8  }
   0xa   :  { %79 = vmatpush.bf16.msra.mxu0 %v144_v2  ;;  %149 = vmatpush.bf16.msra.mxu1 %v144_v2 }
   0xe   :  { %80 = vmatpush.bf16.msra.mxu0 %v143_v3  ;;  %150 = vmatpush.bf16.msra.mxu1 %v143_v3 }
  0x11   :  { %139 = vmatmul.msk.bf16.vlgmr.msra.gmra.mxu0 %vm66_vm0, %v141_v4  ;;  %140 = vmatmul.msk.bf16.vlgmr.msra.gmra.mxu1 %vm66_vm0, %v142_v5 }
  0x8e   :  { %v82_v7 = vpop.f32.mrf.mxu0  ;;  %v87_v8 = vpop.f32.mrf.mxu1 }
  0x8f   :  { %v83_v9 = vadd.f32 %v154_v6, %v82_v7  ;;  %v88_v10 = vadd.f32 %v154_v6, %v87_v8 }
  0x91   :  { %93 = vst.msk [vmem:[#allocation2] sm:$0xff] %vm92_vm1, %v83_v9 }
  0x92   :  { %95 = vst.msk [vmem:[#allocation2 + $0x10] sm:$0xff] %vm92_vm1, %v88_v10 }
  0x96   :  { %v84_v11 = vpop.f32.mrf.mxu0  ;;  %v89_v12 = vpop.f32.mrf.mxu1 }
  0x97   :  { %v85_v13 = vadd.f32 %v154_v6, %v84_v11  ;;  %v90_v14 = vadd.f32 %v154_v6, %v89_v12 }
  0x99   :  { %94 = vst.msk [vmem:[#allocation2 + $0x8] sm:$0xff] %vm92_vm1, %v85_v13 }
  0x9a   :  { %96 = vst.msk [vmem:[#allocation2 + $0x18] sm:$0xff] %vm92_vm1, %v90_v14 }
  0x9b   :  { %109 = dma.vmem_to_hbm [thread:$0]  %s102_s0, 512, %s104_s28, [#allocation3], %s182_s2, %s182_s2, %s183_s29  }
  0x9c   :  { %179 = dma.done.wait [#allocation3], 512  }
  0x9d   :  { %180 = vsyncadd [#allocation3], 4294966784 }
  0x9e   :  { %114 = vsyncpa [#allocation3], 1 }

</bundles_post_ra>
